<compile_context>
chip_gen: v7x
topology: tpu7x:2x2x1
jax: 0.10.0
libtpu: 0.0.40
codegen_flags: <defaults>
</compile_context>

<pallas_src>
import functools

import jax
import jax.numpy as jnp
from jax.experimental import pallas as pl
from jax.experimental.pallas import tpu as pltpu


# ----------------------------------------------------------------------------
# Kernel 1: gate linear — one fused matmul  (B*M, D) @ (D, E) + bias
# ----------------------------------------------------------------------------
def _gate_kernel(x_ref, w_ref, b_ref, out_ref):
    y = jnp.dot(x_ref[...], w_ref[...], preferred_element_type=jnp.float32)
    out_ref[...] = y + b_ref[...]


def gate_forward(cls_tokens, gate_w, gate_b):
    B, M, D = cls_tokens.shape
    E = gate_w.shape[1]
    x = cls_tokens.reshape(B * M, D).astype(jnp.float32)
    out = pl.pallas_call(
        _gate_kernel,
        out_shape=jax.ShapeDtypeStruct((B * M, E), jnp.float32),
        grid=(1,),
        in_specs=[
            pl.BlockSpec((B * M, D), lambda i: (0, 0)),
            pl.BlockSpec((D, E), lambda i: (0, 0)),
            pl.BlockSpec((1, E), lambda i: (0, 0)),
        ],
        out_specs=pl.BlockSpec((B * M, E), lambda i: (0, 0)),
    )(x, gate_w.astype(jnp.float32), gate_b.reshape(1, E).astype(jnp.float32))
    return out.reshape(B, M, E)


# ----------------------------------------------------------------------------
# Kernel 2: fused top-k gather + weighted sum + per-expert class head + mean.
#
# Grid (B, E, K):
#   idx_ref / wts_ref : flat (B*E*K,) scalar-prefetch SMEM (routing table)
#   feat_ref          : (1, 1, L, D) VMEM — ONLY the selected group for this
#                       (b, e, k), gathered via the scalar-prefetch index_map
#   head_w_ref        : (1, D, Cp)  bf16 per-expert 1x1-conv weight (resident
#                       across the k axis)
#   head_b_ref        : (1, 1, Cp)  f32 per-expert bias
#   out_ref           : (1, L, Cp)  f32, written once per batch element
#   feat_acc          : (L, D)  f32 scratch — weighted top-k feature sum
#   logit_acc         : (L, Cp) f32 scratch — running sum over experts
# ----------------------------------------------------------------------------
def _expert_kernel(idx_ref, wts_ref, feat_ref, head_w_ref, head_b_ref,
                   out_ref, feat_acc, logit_acc, *, num_experts, topk):
    b = pl.program_id(0)
    e = pl.program_id(1)
    k = pl.program_id(2)

    flat = (b * num_experts + e) * topk + k
    w_k = wts_ref[flat]                                    # scalar routing weight

    @pl.when(k == 0)
    def _():
        feat_acc[...] = jnp.zeros_like(feat_acc)

    # Weighted top-k combine in f32 (gathered group already in VMEM).
    feat_acc[...] += w_k * feat_ref[0, 0].astype(jnp.float32)

    @pl.when(k == topk - 1)
    def _():
        @pl.when(e == 0)
        def _():
            logit_acc[...] = jnp.zeros_like(logit_acc)

        # bf16 MXU inputs, f32 accumulation; bias folded once per expert tile.
        x = feat_acc[...].astype(jnp.bfloat16)             # (L, D)
        logits = jnp.dot(x, head_w_ref[0],                 # (L, Cp) lane-dense
                         preferred_element_type=jnp.float32)
        logit_acc[...] += logits + head_b_ref[0]

        @pl.when(e == num_experts - 1)
        def _():
            out_ref[0] = (logit_acc[...] *
                          (1.0 / num_experts)).astype(out_ref.dtype)


def moe_expert_heads(patch_tokens, idx_flat, wts_flat, head_w, head_b, *, topk):
    # patch_tokens: (B, M, L, D) f32
    # idx_flat / wts_flat: (B*E*K,) int32 / f32, flat index (b*E + e)*K + k
    # head_w: (E, D, Cp) bf16 ; head_b: (E, 1, Cp) f32
    B, M, L, D = patch_tokens.shape
    E, _, Cp = head_w.shape
    K = topk
    kernel = functools.partial(_expert_kernel, num_experts=E, topk=K)

    def feat_map(b, e, k, idx_ref, wts_ref):
        # Gather only the routed feature group for this (b, e, k).
        return (b, idx_ref[(b * E + e) * K + k], 0, 0)

    return pl.pallas_call(
        kernel,
        out_shape=jax.ShapeDtypeStruct((B, L, Cp), jnp.float32),
        grid_spec=pltpu.PrefetchScalarGridSpec(
            num_scalar_prefetch=2,
            grid=(B, E, K),
            in_specs=[
                pl.BlockSpec((1, 1, L, D), feat_map),
                pl.BlockSpec((1, D, Cp), lambda b, e, k, idx, wts: (e, 0, 0)),
                pl.BlockSpec((1, 1, Cp), lambda b, e, k, idx, wts: (e, 0, 0)),
            ],
            out_specs=pl.BlockSpec((1, L, Cp),
                                   lambda b, e, k, idx, wts: (b, 0, 0)),
            scratch_shapes=[
                pltpu.VMEM((L, D), jnp.float32),   # weighted feature accumulator
                pltpu.VMEM((L, Cp), jnp.float32),  # expert-sum accumulator
            ],
        ),
        # At production scale (large L) add an L-tiling grid axis and/or
        # pltpu.CompilerParams(vmem_limit_bytes=...) here; at the per-step
        # footprint used below the default scoped VMEM is plenty.
        compiler_params=pltpu.CompilerParams(
            dimension_semantics=("parallel", "arbitrary", "arbitrary")),
    )(idx_flat, wts_flat, patch_tokens, head_w, head_b)


# ----------------------------------------------------------------------------
# Full MoEUpperNet forward
# ----------------------------------------------------------------------------
def moe_uppernet_forward(features, params, *, topk, image_size):
    B, M, S, D = features.shape
    E = params["head_w"].shape[0]
    C = params["head_w"].shape[-1]
    if topk == -1:
        topk = M
    L = S - 1
    Hp = int(round(L ** 0.5))
    assert Hp * Hp == L, "patch tokens must form a square grid"
    assert image_size % Hp == 0, "image_size must be a multiple of sqrt(L)"

    cls_tokens = features[:, :, 0, :]            # (B, M, D)
    patch_tokens = features[:, :, 1:, :]         # (B, M, L, D)

    # Gate linear (Pallas, single matmul) -> softmax over groups (glue).
    gate_score = gate_forward(cls_tokens, params["gate_w"], params["gate_b"])
    gate_score = jnp.transpose(gate_score, (0, 2, 1))          # (B, E, M)
    gate_prob = jax.nn.softmax(gate_score, axis=-1)

    # Top-k routing (glue; no clean Pallas top-k on TPU).
    topk_vals, topk_idx = jax.lax.top_k(gate_prob, topk)       # (B, E, K)
    topk_wts = jax.nn.softmax(topk_vals, axis=-1)              # (B, E, K)
    idx_flat = topk_idx.reshape(-1).astype(jnp.int32)          # (B*E*K,)
    wts_flat = topk_wts.reshape(-1).astype(jnp.float32)        # (B*E*K,)

    # Lane-dense head: pad num_classes up to a multiple of 128; bf16 weights.
    Cp = ((C + 127) // 128) * 128
    head_w = params["head_w"].astype(jnp.bfloat16)             # (E, D, C)
    head_b = params["head_b"].astype(jnp.float32)              # (E, C)
    if Cp != C:
        head_w = jnp.pad(head_w, ((0, 0), (0, 0), (0, Cp - C)))
        head_b = jnp.pad(head_b, ((0, 0), (0, Cp - C)))
    head_b = head_b.reshape(E, 1, Cp)
    # NOTE: at real scale also keep D a multiple of 128 (here D equals the full
    # array dim, so the block layout is legal as-is).

    # Fused gather + weighted sum + per-expert head + expert mean (Pallas).
    token_logits = moe_expert_heads(
        patch_tokens.astype(jnp.float32), idx_flat, wts_flat, head_w, head_b,
        topk=topk)                                             # (B, L, Cp)
    logits = token_logits[:, :, :C]                            # (B, L, C)

    # TODO(synk): UPerNet's PSP/FPN conv decoder is not provided in the
    # snippet; it is simplified to a per-expert 1x1-conv head over the patch
    # tokens followed by nearest-neighbor upsampling to image_size.
    x = logits.reshape(B, Hp, Hp, C)
    scale = image_size // Hp
    x = jnp.repeat(jnp.repeat(x, scale, axis=1), scale, axis=2)
    return jnp.transpose(x, (0, 3, 1, 2))                      # NCHW


# ----------------------------------------------------------------------------
# Pure-JAX reference (mirrors the PyTorch forward, f32 end-to-end)
# ----------------------------------------------------------------------------
def reference_forward(features, params, *, topk, image_size):
    B, M, S, D = features.shape
    if topk == -1:
        topk = M
    L = S - 1
    cls_tokens = features[:, :, 0, :]
    feats = features[:, :, 1:, :]
    gate = jnp.einsum("bmd,de->bme", cls_tokens, params["gate_w"]) + params["gate_b"]
    gate = jnp.transpose(gate, (0, 2, 1))
    prob = jax.nn.softmax(gate, axis=-1)
    E = params["head_w"].shape[0]
    expert_logits = []
    for i in range(E):
        vals, idx = jax.lax.top_k(prob[:, i, :], topk)                     # (B, K)
        w = jax.nn.softmax(vals, axis=-1)
        sel = jnp.take_along_axis(feats, idx[:, :, None, None], axis=1)    # (B,K,L,D)
        comb = jnp.sum(sel * w[:, :, None, None], axis=1)                  # (B, L, D)
        logit = jnp.einsum("bld,dc->blc", comb, params["head_w"][i]) + params["head_b"][i]
        expert_logits.append(logit)
    logits = jnp.mean(jnp.stack(expert_logits, axis=-1), axis=-1)          # (B, L, C)
    Hp = int(round(L ** 0.5))
    C = logits.shape[-1]
    x = logits.reshape(B, Hp, Hp, C)
    scale = image_size // Hp
    x = jnp.repeat(jnp.repeat(x, scale, axis=1), scale, axis=2)
    return jnp.transpose(x, (0, 3, 1, 2))


# ----------------------------------------------------------------------------
if __name__ == "__main__":
    # Small, deterministic configuration.
    B, M = 2, 4                # batch, feature groups (routing dimension)
    L, D = 16, 32              # 4x4 patch tokens, embed_dim
    S = 1 + L                  # +1 CLS token
    num_experts = 2
    topk = 3
    num_classes = 5
    image_size = 8             # upsample 4x4 -> 8x8

    key = jax.random.PRNGKey(0)
    k_feat, k_gw, k_gb, k_hw, k_hb = jax.random.split(key, 5)

    features = jax.random.normal(k_feat, (B, M, S, D), dtype=jnp.float32)
    params = {
        "gate_w": 0.1 * jax.random.normal(k_gw, (D, num_experts), dtype=jnp.float32),
        "gate_b": 0.1 * jax.random.normal(k_gb, (num_experts,), dtype=jnp.float32),
        "head_w": 0.1 * jax.random.normal(k_hw, (num_experts, D, num_classes),
                                          dtype=jnp.float32),
        "head_b": 0.1 * jax.random.normal(k_hb, (num_experts, num_classes),
                                          dtype=jnp.float32),
    }

    out = moe_uppernet_forward(features, params, topk=topk, image_size=image_size)
    out = jax.block_until_ready(out)

    ref = reference_forward(features, params, topk=topk, image_size=image_size)
    ref = jax.block_until_ready(ref)

    assert out.shape == (B, num_classes, image_size, image_size), out.shape
    # bf16 MXU inputs (f32 accumulate) -> tolerance loosened vs pure-f32 ref.
    max_diff = float(jnp.max(jnp.abs(out - ref)))
    assert jnp.allclose(out, ref, atol=3e-2, rtol=3e-2), (
        "mismatch vs reference, max abs diff=%g" % max_diff)

    print("KERNEL_OK")
</pallas_src>

<mosaic_0001>
module attributes {stable_mosaic.version = 11 : i64} {
  func.func @_gate_kernel(%arg0: i32, %arg1: memref<8x32xf32, #tpu.memory_space<vmem>>, %arg2: memref<32x2xf32, #tpu.memory_space<vmem>>, %arg3: memref<1x2xf32, #tpu.memory_space<vmem>>, %arg4: memref<8x2xf32, #tpu.memory_space<vmem>>) attributes {dimension_semantics = [#tpu.dimension_semantics<arbitrary>], iteration_bounds = array<i64: 1>, scalar_prefetch = 0 : i64, scratch_operands = 0 : i64, tpu.core_type = #tpu.core_type<tc>, window_params = [{pipeline_mode = #tpu.pipeline_mode<synchronous>, transform_indices = @transform_0, window_bounds = array<i64: 8, 32>}, {pipeline_mode = #tpu.pipeline_mode<synchronous>, transform_indices = @transform_1, window_bounds = array<i64: 32, 2>}, {pipeline_mode = #tpu.pipeline_mode<synchronous>, transform_indices = @transform_2, window_bounds = array<i64: 1, 2>}, {pipeline_mode = #tpu.pipeline_mode<synchronous>, transform_indices = @transform_3, window_bounds = array<i64: 8, 2>}]} {
    %c0 = arith.constant 0 : index
    %c0_0 = arith.constant 0 : index
    %0 = vector.load %arg1[%c0, %c0_0] : memref<8x32xf32, #tpu.memory_space<vmem>>, vector<8x32xf32>
    %c0_1 = arith.constant 0 : index
    %c0_2 = arith.constant 0 : index
    %1 = vector.load %arg2[%c0_1, %c0_2] : memref<32x2xf32, #tpu.memory_space<vmem>>, vector<32x2xf32>
    %cst = arith.constant dense<0.000000e+00> : vector<8x2xf32>
    %2 = tpu.matmul %0, %1, %cst {dimension_numbers = #tpu.dot_dimension_numbers<[1], [0], [0], [1], [0, 0, 1, 1], [], []>} : vector<8x32xf32>, vector<32x2xf32>, vector<8x2xf32> -> vector<8x2xf32>
    %c0_3 = arith.constant 0 : index
    %c0_4 = arith.constant 0 : index
    %3 = vector.load %arg3[%c0_3, %c0_4] : memref<1x2xf32, #tpu.memory_space<vmem>>, vector<1x2xf32>
    %4 = vector.broadcast %3 : vector<1x2xf32> to vector<8x2xf32>
    %5 = arith.addf %2, %4 : vector<8x2xf32>
    %c0_5 = arith.constant 0 : index
    %c0_6 = arith.constant 0 : index
    %6 = vector.load %arg4[%c0_5, %c0_6] : memref<8x2xf32, #tpu.memory_space<vmem>>, vector<8x2xf32>
    tpu.vector_store %arg4[%c0_5, %c0_6], %5 {strides = array<i32>} : memref<8x2xf32, #tpu.memory_space<vmem>>, vector<8x2xf32>,
    return
  }
  func.func @transform_0(%arg0: i32) -> (i32, i32) {
    %c0_i32 = arith.constant 0 : i32
    %c0_i32_0 = arith.constant 0 : i32
    %c0_i32_1 = arith.constant 0 : i32
    return %c0_i32, %c0_i32_0 : i32, i32
  }
  func.func @transform_1(%arg0: i32) -> (i32, i32) {
    %c0_i32 = arith.constant 0 : i32
    %c0_i32_0 = arith.constant 0 : i32
    %c0_i32_1 = arith.constant 0 : i32
    return %c0_i32, %c0_i32_0 : i32, i32
  }
  func.func @transform_2(%arg0: i32) -> (i32, i32) {
    %c0_i32 = arith.constant 0 : i32
    %c0_i32_0 = arith.constant 0 : i32
    %c0_i32_1 = arith.constant 0 : i32
    return %c0_i32, %c0_i32_0 : i32, i32
  }
  func.func @transform_3(%arg0: i32) -> (i32, i32) {
    %c0_i32 = arith.constant 0 : i32
    %c0_i32_0 = arith.constant 0 : i32
    %c0_i32_1 = arith.constant 0 : i32
    return %c0_i32, %c0_i32_0 : i32, i32
  }
}

</mosaic_0001>

<bundles_post_ra>
// kernel: tpu_custom_call.1
= control target key start
LH: loop header
LB: loop body
LE: loop exit
PB: predicated region body
PF: predicated region fallthrough
CT: control target
= control target key end

     0   :  { %v133_v0 = vmov 0.0|0.0   ;;  %vm134_vm0 = vmmov 0   ;;  %v135_v4 = vmov 0.0   ;;  %vm26_vm1 = vcmask 261120   ;;  %s177_s1 = inlined_call_operand.vmem [shape: f32[32,2], index: 1, kind: input, shape index: {}]   ;;  %s178_s0 = inlined_call_operand.vmem [shape: f32[8,32], index: 0, kind: input, shape index: {}]   ;;  %s179_s2 = inlined_call_operand.vmem [shape: f32[1,2], index: 2, kind: input, shape index: {}]   ;;  %s180_s3 = inlined_call_operand.vmem [shape: f32[8,2], index: 3, kind: output, shape index: {}]  }
   0x1   :  { %124 = vmatprep.subr.bf16.mxu0 %v133_v0  ;;  %v15_v1 = vld [vmem:[%s177_s1] sm:$0xff]  ;;  %v16_v2 = vld [vmem:[%s177_s1 + $0x8] sm:$0xff]  ;;  %v17_v3 = vld [vmem:[%s177_s1 + $0x10] sm:$0xff]  ;;  %121 = vmatprep.mubr.msk.f32.mxu0 %vm134_vm0, %v135_v4  ;;  %vm100_vm2 = vcmask 15360  }
   0x2   :  { %v125_v5 = vpack.c.bf16 %v16_v2, %v15_v1  ;;  %v18_v6 = vld [vmem:[%s177_s1 + $0x18] sm:$0xff]  ;;  %v14_v8 = vld [vmem:[%s178_s0] sm:$0xff] }
   0x3   :  { %v128_v7 = vpack.c.bf16 %v18_v6, %v17_v3  ;;  %v106_v9 = vld [vmem:[%s179_s2] ss:$0 sm:$0xff] }
   0x4   :  { %126 = vmatpush3.bf16.msra.mxu0 %v125_v5 }
   0x5   :  { %127 = vmatprep.subr.bf16.mxu0 %v133_v0 }
   0x8   :  { %129 = vmatpush3.bf16.msra.mxu0 %v128_v7 }
   0xb   :  { %122 = vmatmul.mubr.msk.f32.vlgmr.msra.gmra.mrb[0].mxu0 %vm26_vm1, %v14_v8 }
  0xde   :  { %v96_v10 = vpop.f32.mrb[0].mxu0 }
  0xdf   :  { %v97_v11 = vadd.f32 %v106_v9, %v96_v10  ;;  %v123_v12 = vpop.f32.mrb[1].mxu0 }
  0xe1   :  { %101 = vst.msk [vmem:[%s180_s3] sm:$0xff] %vm100_vm2, %v97_v11 }

</bundles_post_ra>
